<compile_context>
chip_gen: v7x
topology: tpu7x:2x2x1
jax: 0.10.0
libtpu: 0.0.40
codegen_flags: <defaults>
</compile_context>

<pallas_src>
import numpy as np
import jax
import jax.numpy as jnp
from jax.experimental import pallas as pl
from jax.experimental.pallas import tpu as pltpu

LANE = 128
SUBLANE = 8


def _round_up(x, m):
    return ((x + m - 1) // m) * m


# ---------------------------------------------------------------------------
# Pallas kernel (the single hot path: patches @ W_folded + bias)
# ---------------------------------------------------------------------------
def _proj_matmul_bias_kernel(x_ref, w_ref, b_ref, o_ref):
    # x_ref: (bm, K) raw-pixel patches (bf16/f32), w_ref: (K, bn) folded weight,
    # b_ref: (1, bn) bias (kept f32), o_ref: (bm, bn).
    acc = jnp.dot(x_ref[...], w_ref[...], preferred_element_type=jnp.float32)
    o_ref[...] = (acc + b_ref[...]).astype(o_ref.dtype)


def _default_block_m():
    """Bigger row tile where VMEM allows (v6e: 128 MiB); 512 elsewhere."""
    try:
        if pltpu.get_tpu_info().vmem_capacity_bytes >= 100 * 2**20:
            return 1024
    except Exception:
        pass
    return 512


def patch_proj_pallas(patches, w2d, bias2d, *, block_m=None, block_n=512,
                      out_dtype=None, weight_resident_bytes=8 * 2**20):
    """(P, K) @ (K, E) + (1, E) -> (P, E), tiled over rows (and E if needed)."""
    P, K = patches.shape
    Kw, E = w2d.shape
    assert Kw == K
    if out_dtype is None:
        out_dtype = patches.dtype
    if block_m is None:
        block_m = _default_block_m()

    in_b = jnp.dtype(patches.dtype).itemsize
    w_b = jnp.dtype(w2d.dtype).itemsize
    o_b = jnp.dtype(out_dtype).itemsize

    # ---- row (M) tiling: large tiles amortize the ~0.35us/step overhead, but
    # keep >= ~4 grid steps so DMA/compute overlap and megacore sharding (v7x,
    # 2 TCs) actually engage for small-P calls.  bm must be a multiple of 8
    # (sublane) or equal the full dim; the partial last block is masked.
    bm = min(block_m, P)
    if P > SUBLANE and pl.cdiv(P, bm) < 4:
        bm = min(block_m, max(SUBLANE, _round_up(pl.cdiv(P, 4), SUBLANE)))
    grid_m = pl.cdiv(P, bm)

    # ---- E (N) tiling: only when the folded weight is too big to stay
    # resident in VMEM (e.g. DCT-prune K=3072, E>=1024 on v7x's 64 MiB).
    if K * E * w_b > weight_resident_bytes and E > block_n:
        bn = block_n
    else:
        bn = E
    grid_n = pl.cdiv(E, bn)

    # Working-set based scoped-VMEM limit (conservative: weight double counted)
    # so v5e's 16 MiB default never silently shrinks tiles; capped under v7x's
    # 64 MiB physical VMEM.
    vmem_need = (2 * bm * K * in_b + 2 * K * bn * w_b
                 + 2 * bm * bn * o_b + 2 * bn * 4)
    vmem_limit = int(min(64 * 2**20,
                         max(vmem_need * 5 // 4 + (2 << 20), 32 * 2**20)))

    cost = pl.CostEstimate(
        flops=2 * P * K * E,
        transcendentals=0,
        # With j (E-tile) outer / i (row-tile) inner, the LHS is streamed once
        # per E-tile, the weight exactly once, the output written once.
        bytes_accessed=grid_n * P * K * in_b + K * E * w_b + P * E * o_b + E * 4,
    )
    cparams = pltpu.CompilerParams(
        dimension_semantics=("parallel", "parallel"),
        vmem_limit_bytes=vmem_limit,
    )

    def run(single_buffer_resident):
        # Weight/bias have a constant index_map when grid_n == 1 -> single
        # buffer them (halves their VMEM footprint vs default double buffer).
        res_mode = (pl.Buffered(1)
                    if (single_buffer_resident and grid_n == 1) else None)
        in_specs = [
            pl.BlockSpec((bm, K), lambda j, i: (i, 0)),                    # rows
            pl.BlockSpec((K, bn), lambda j, i: (0, j), pipeline_mode=res_mode),
            pl.BlockSpec((1, bn), lambda j, i: (0, j), pipeline_mode=res_mode),
        ]
        out_specs = pl.BlockSpec((bm, bn), lambda j, i: (i, j))
        return pl.pallas_call(
            _proj_matmul_bias_kernel,
            out_shape=jax.ShapeDtypeStruct((P, E), out_dtype),
            grid=(grid_n, grid_m),
            in_specs=in_specs,
            out_specs=out_specs,
            compiler_params=cparams,
            cost_estimate=cost,
        )(patches, w2d, bias2d)

    if grid_n == 1:
        try:
            return run(True)
        except Exception:
            # Older jax without single-buffer pipeline_mode support: fall back
            # to the default double-buffered (still correct) pipeline.
            return run(False)
    return run(False)


# ---------------------------------------------------------------------------
# Host-side parameter preparation (tiny, done once)
# ---------------------------------------------------------------------------
def dct_matrix(N, dtype=jnp.float32):
    """Orthonormal DCT-II matrix D (== torchjpeg block_dct normalization)."""
    n = jnp.arange(N, dtype=dtype)
    k = jnp.arange(N, dtype=dtype)[:, None]
    D = jnp.cos(jnp.pi * (2.0 * n[None, :] + 1.0) * k / (2.0 * N))
    alpha = jnp.where(k == 0, jnp.sqrt(1.0 / N), jnp.sqrt(2.0 / N))
    return (alpha * D).astype(dtype)


def _retained_coeffs(N, img_size, model_input_size):
    """Number of retained DCT coefficients per axis (matches the PyTorch
    `int(N / (img / model))` float rounding)."""
    if tuple(img_size) == tuple(model_input_size):
        return N
    assert (N * model_input_size[0]) % img_size[0] == 0, (
        "ambiguous non-integer DCT prune ratio")
    return int(N / (img_size[0] / model_input_size[0]))


def fold_dct_into_weight(weight, D, r):
    """Fold block-DCT + top-left r x r prune into the conv weight.

    weight: (E, C, p, p) conv weight acting in the (pruned) DCT domain.
    Returns Wfold: (E, C, pin, pin) acting directly on raw-pixel patches,
    where pin = (p // r) * N,   N = D.shape[0].
    """
    E, C, p, _ = weight.shape
    N = D.shape[0]
    nb = p // r
    Dr = D[:r, :]                                    # (r, N) retained DCT rows
    w = weight.reshape(E, C, nb, r, nb, r)
    wf = jnp.einsum("ecxuyv,ua,vb->ecxayb", w, Dr, Dr)
    return wf.reshape(E, C, nb * N, nb * N)


def make_params(weight, bias, *, img_size, patch_size, model_input_size,
                dct_block, compute_dtype=jnp.bfloat16):
    """Precompute the folded projection weight (K_pad, E) and bias (1, E)."""
    img_size = tuple(img_size)
    model_input_size = tuple(model_input_size)
    N = dct_block
    D = dct_matrix(N, jnp.float32)
    r = _retained_coeffs(N, img_size, model_input_size)
    p = patch_size[0]
    assert p % r == 0, "patch_size must be a multiple of retained DCT coeffs"

    # Fold in f32; cast to compute dtype only at the very end so the DCT fold
    # does not compound bf16 rounding.
    wf = fold_dct_into_weight(weight.astype(jnp.float32), D, r)
    E, C, pin, _ = wf.shape
    K = C * pin * pin
    w2d = wf.reshape(E, K).T                         # (K, E), row-major (c, i, j)
    K_pad = _round_up(K, LANE)                       # lane-align the contraction
    if K_pad != K:                                   # (std ViT: 768/3072 -> no-op)
        w2d = jnp.pad(w2d, ((0, K_pad - K), (0, 0)))  # zero rows: no-op in the dot
    if compute_dtype is not None:
        w2d = w2d.astype(compute_dtype)
    return {
        "w2d": w2d,
        "bias2d": bias.reshape(1, E).astype(jnp.float32),  # bias add stays f32
    }


# ---------------------------------------------------------------------------
# Forward (mirrors PatchEmbedDCT_P.forward, ro_ds == 1 path, norm = Identity)
# ---------------------------------------------------------------------------
def patch_embed_dct_p_forward(x, params, *, img_size, patch_size,
                              model_input_size, dct_block, flatten=True,
                              compute_dtype=jnp.bfloat16, out_dtype=None,
                              block_m=None, block_n=512):
    B, C, H, W = x.shape
    N = dct_block
    img_size = tuple(img_size)
    model_input_size = tuple(model_input_size)
    p = patch_size[0]
    r = _retained_coeffs(N, img_size, model_input_size)
    pin = (p // r) * N                              # raw-pixel patch size
    Gh = model_input_size[0] // p
    Gw = model_input_size[1] // p

    # TODO(synk): ro_ds > 1 branch (space-to-depth + 1x1 conv) not implemented;
    # default ro_ds == 1 path only.
    # TODO(synk): fold the patch extraction below into the Pallas kernel (grid
    # over batch x patch-row bands) to remove this HBM round trip entirely; the
    # required in-VMEM lane-splitting relayout (pin < 128) is fragile under
    # Mosaic, so it stays in XLA and its cost is halved by casting first.

    # Cast BEFORE the patchify transpose: halves the copy's read+write traffic
    # and the kernel's LHS read (bf16 is also the MXU-native input dtype).
    if compute_dtype is not None and x.dtype != compute_dtype:
        x = x.astype(compute_dtype)

    # Single layout pass: non-overlapping (C, pin, pin) raw-pixel patches,
    # flattened row-major (c, i, j) to match the folded weight.
    patches = (
        x.reshape(B, C, Gh, pin, Gw, pin)
        .transpose(0, 2, 4, 1, 3, 5)
        .reshape(B * Gh * Gw, C * pin * pin)
    )
    K = patches.shape[1]
    K_pad = params["w2d"].shape[0]
    if K_pad != K:
        patches = jnp.pad(patches, ((0, 0), (0, K_pad - K)))

    if out_dtype is None:
        out_dtype = patches.dtype                   # bf16 out on the fast path

    out = patch_proj_pallas(patches, params["w2d"], params["bias2d"],
                            block_m=block_m, block_n=block_n,
                            out_dtype=out_dtype)
    E = out.shape[-1]
    out = out.reshape(B, Gh * Gw, E)                # flatten(2).transpose(1, 2)
    if not flatten:
        out = out.reshape(B, Gh, Gw, E).transpose(0, 3, 1, 2)
    # norm = Identity
    return out


# ---------------------------------------------------------------------------
# Pure-JAX reference (full original semantics: block DCT, prune, conv)
# ---------------------------------------------------------------------------
def reference_forward(x, weight, bias, D, patch, model_hw):
    B, C, H, W = x.shape
    N = D.shape[0]
    Hb, Wb = H // N, W // N
    r = (N * model_hw[0]) // H
    blk = x.reshape(B, C, Hb, N, Wb, N).transpose(0, 1, 2, 4, 3, 5)
    dct_blk = jnp.einsum("ui,bchwij,vj->bchwuv", D, blk, D)
    dct_blk = dct_blk[..., :r, :r]
    img = dct_blk.transpose(0, 1, 2, 4, 3, 5).reshape(B, C, Hb * r, Wb * r)
    y = jax.lax.conv_general_dilated(
        img, weight, window_strides=(patch, patch), padding="VALID",
        dimension_numbers=("NCHW", "OIHW", "NCHW"))
    y = y + bias[None, :, None, None]
    Bo, E, Gh, Gw = y.shape
    return y.reshape(Bo, E, Gh * Gw).transpose(0, 2, 1)


# ---------------------------------------------------------------------------
if __name__ == "__main__":
    B, C = 2, 3
    patch, embed_dim, dct_block = 8, 32, 8

    key = jax.random.PRNGKey(0)
    k1, k2, k3, k4, k5 = jax.random.split(key, 5)
    weight = jax.random.normal(k2, (embed_dim, C, patch, patch), jnp.float32) * 0.02
    bias = jax.random.normal(k3, (embed_dim,), jnp.float32) * 0.02
    D = dct_matrix(dct_block)

    # ---- case 1: img_size == model_input_size (no prune), strict f32 path ----
    Hs = Ws = 16
    x = jax.random.normal(k1, (B, C, Hs, Ws), jnp.float32)
    params = make_params(weight, bias, img_size=(Hs, Ws), patch_size=(patch, patch),
                         model_input_size=(Hs, Ws), dct_block=dct_block,
                         compute_dtype=jnp.float32)
    out = jax.block_until_ready(patch_embed_dct_p_forward(
        x, params, img_size=(Hs, Ws), patch_size=(patch, patch),
        model_input_size=(Hs, Ws), dct_block=dct_block, flatten=True,
        compute_dtype=jnp.float32))
    num_patches = (Hs // patch) * (Ws // patch)
    assert out.shape == (B, num_patches, embed_dim), out.shape
    ref = jax.block_until_ready(reference_forward(x, weight, bias, D, patch, (Hs, Ws)))
    np.testing.assert_allclose(np.asarray(out), np.asarray(ref), rtol=1e-4, atol=1e-4)

    # ---- case 2: img_size != model_input_size (DCT prune path), strict f32 ----
    Hi = Wi = 32
    model = 16
    x2 = jax.random.normal(k4, (B, C, Hi, Wi), jnp.float32)
    params2 = make_params(weight, bias, img_size=(Hi, Wi), patch_size=(patch, patch),
                          model_input_size=(model, model), dct_block=dct_block,
                          compute_dtype=jnp.float32)
    out2 = jax.block_until_ready(patch_embed_dct_p_forward(
        x2, params2, img_size=(Hi, Wi), patch_size=(patch, patch),
        model_input_size=(model, model), dct_block=dct_block, flatten=True,
        compute_dtype=jnp.float32))
    assert out2.shape == (B, (model // patch) ** 2, embed_dim), out2.shape
    ref2 = jax.block_until_ready(reference_forward(x2, weight, bias, D, patch,
                                                   (model, model)))
    np.testing.assert_allclose(np.asarray(out2), np.asarray(ref2),
                               rtol=1e-4, atol=1e-4)

    # ---- case 3: DEFAULT fast path (bf16 in / f32 accumulate / bf16 out) ----
    params_bf = make_params(weight, bias, img_size=(Hs, Ws), patch_size=(patch, patch),
                            model_input_size=(Hs, Ws), dct_block=dct_block)
    out_bf = jax.block_until_ready(patch_embed_dct_p_forward(
        x, params_bf, img_size=(Hs, Ws), patch_size=(patch, patch),
        model_input_size=(Hs, Ws), dct_block=dct_block, flatten=True))
    np.testing.assert_allclose(np.asarray(out_bf.astype(jnp.float32)),
                               np.asarray(ref), rtol=5e-2, atol=5e-2)

    # ---- case 4: P not a multiple of the row tile (partial last grid block) --
    B4 = 10
    x4 = jax.random.normal(k5, (B4, C, Hs, Ws), jnp.float32)
    out4 = jax.block_until_ready(patch_embed_dct_p_forward(
        x4, params, img_size=(Hs, Ws), patch_size=(patch, patch),
        model_input_size=(Hs, Ws), dct_block=dct_block, flatten=True,
        compute_dtype=jnp.float32))
    ref4 = jax.block_until_ready(reference_forward(x4, weight, bias, D, patch,
                                                   (Hs, Ws)))
    np.testing.assert_allclose(np.asarray(out4), np.asarray(ref4),
                               rtol=1e-4, atol=1e-4)

    print("KERNEL_OK")
</pallas_src>

<mosaic_0001>
module attributes {stable_mosaic.version = 11 : i64} {
  func.func @_proj_matmul_bias_kernel(%arg0: i32, %arg1: i32, %arg2: memref<8x256xf32, #tpu.memory_space<vmem>>, %arg3: memref<256x32xf32, #tpu.memory_space<vmem>>, %arg4: memref<1x32xf32, #tpu.memory_space<vmem>>, %arg5: memref<8x32xf32, #tpu.memory_space<vmem>>) attributes {dimension_semantics = [#tpu.dimension_semantics<parallel>, #tpu.dimension_semantics<parallel>], iteration_bounds = array<i64: 1, 1>, scalar_prefetch = 0 : i64, scratch_operands = 0 : i64, tpu.core_type = #tpu.core_type<tc>, window_params = [{transform_indices = @transform_0, window_bounds = array<i64: 8, 256>}, {pipeline_mode = #tpu.pipeline_mode<synchronous>, transform_indices = @transform_1, window_bounds = array<i64: 256, 32>}, {pipeline_mode = #tpu.pipeline_mode<synchronous>, transform_indices = @transform_2, window_bounds = array<i64: 1, 32>}, {transform_indices = @transform_3, window_bounds = array<i64: 8, 32>}]} {
    %c0 = arith.constant 0 : index
    %c0_0 = arith.constant 0 : index
    %0 = vector.load %arg2[%c0, %c0_0] : memref<8x256xf32, #tpu.memory_space<vmem>>, vector<8x256xf32>
    %c0_1 = arith.constant 0 : index
    %c0_2 = arith.constant 0 : index
    %1 = vector.load %arg3[%c0_1, %c0_2] : memref<256x32xf32, #tpu.memory_space<vmem>>, vector<256x32xf32>
    %cst = arith.constant dense<0.000000e+00> : vector<8x32xf32>
    %2 = tpu.matmul %0, %1, %cst {dimension_numbers = #tpu.dot_dimension_numbers<[1], [0], [0], [1], [0, 0, 1, 1], [], []>} : vector<8x256xf32>, vector<256x32xf32>, vector<8x32xf32> -> vector<8x32xf32>
    %c0_3 = arith.constant 0 : index
    %c0_4 = arith.constant 0 : index
    %3 = vector.load %arg4[%c0_3, %c0_4] : memref<1x32xf32, #tpu.memory_space<vmem>>, vector<1x32xf32>
    %4 = vector.broadcast %3 : vector<1x32xf32> to vector<8x32xf32>
    %5 = arith.addf %2, %4 : vector<8x32xf32>
    %c0_5 = arith.constant 0 : index
    %c0_6 = arith.constant 0 : index
    %6 = vector.load %arg5[%c0_5, %c0_6] : memref<8x32xf32, #tpu.memory_space<vmem>>, vector<8x32xf32>
    tpu.vector_store %arg5[%c0_5, %c0_6], %5 {strides = array<i32>} : memref<8x32xf32, #tpu.memory_space<vmem>>, vector<8x32xf32>,
    return
  }
  func.func @transform_0(%arg0: i32, %arg1: i32) -> (i32, i32) {
    %c0_i32 = arith.constant 0 : i32
    %c0_i32_0 = arith.constant 0 : i32
    return %arg1, %c0_i32 : i32, i32
  }
  func.func @transform_1(%arg0: i32, %arg1: i32) -> (i32, i32) {
    %c0_i32 = arith.constant 0 : i32
    %c0_i32_0 = arith.constant 0 : i32
    return %c0_i32, %arg0 : i32, i32
  }
  func.func @transform_2(%arg0: i32, %arg1: i32) -> (i32, i32) {
    %c0_i32 = arith.constant 0 : i32
    %c0_i32_0 = arith.constant 0 : i32
    return %c0_i32, %arg0 : i32, i32
  }
  func.func @transform_3(%arg0: i32, %arg1: i32) -> (i32, i32) {
    %c0_i32 = arith.constant 0 : i32
    return %arg1, %arg0 : i32, i32
  }
}

module attributes {stable_mosaic.version = 11 : i64} {
  func.func @_proj_matmul_bias_kernel(%arg0: i32, %arg1: i32, %arg2: memref<8x256xf32, #tpu.memory_space<vmem>>, %arg3: memref<256x32xf32, #tpu.memory_space<vmem>>, %arg4: memref<1x32xf32, #tpu.memory_space<vmem>>, %arg5: memref<8x32xf32, #tpu.memory_space<vmem>>) attributes {dimension_semantics = [#tpu.dimension_semantics<parallel>, #tpu.dimension_semantics<parallel>], iteration_bounds = array<i64: 1, 1>, scalar_prefetch = 0 : i64, scratch_operands = 0 : i64, tpu.core_type = #tpu.core_type<tc>, window_params = [{transform_indices = @transform_0, window_bounds = array<i64: 8, 256>}, {transform_indices = @transform_1, window_bounds = array<i64: 256, 32>}, {transform_indices = @transform_2, window_bounds = array<i64: 1, 32>}, {transform_indices = @transform_3, window_bounds = array<i64: 8, 32>}]} {
    %c0 = arith.constant 0 : index
    %c0_0 = arith.constant 0 : index
    %0 = vector.load %arg2[%c0, %c0_0] : memref<8x256xf32, #tpu.memory_space<vmem>>, vector<8x256xf32>
    %c0_1 = arith.constant 0 : index
    %c0_2 = arith.constant 0 : index
    %1 = vector.load %arg3[%c0_1, %c0_2] : memref<256x32xf32, #tpu.memory_space<vmem>>, vector<256x32xf32>
    %cst = arith.constant dense<0.000000e+00> : vector<8x32xf32>
    %2 = tpu.matmul %0, %1, %cst {dimension_numbers = #tpu.dot_dimension_numbers<[1], [0], [0], [1], [0, 0, 1, 1], [], []>} : vector<8x256xf32>, vector<256x32xf32>, vector<8x32xf32> -> vector<8x32xf32>
    %c0_3 = arith.constant 0 : index
    %c0_4 = arith.constant 0 : index
    %3 = vector.load %arg4[%c0_3, %c0_4] : memref<1x32xf32, #tpu.memory_space<vmem>>, vector<1x32xf32>
    %4 = vector.broadcast %3 : vector<1x32xf32> to vector<8x32xf32>
    %5 = arith.addf %2, %4 : vector<8x32xf32>
    %c0_5 = arith.constant 0 : index
    %c0_6 = arith.constant 0 : index
    %6 = vector.load %arg5[%c0_5, %c0_6] : memref<8x32xf32, #tpu.memory_space<vmem>>, vector<8x32xf32>
    tpu.vector_store %arg5[%c0_5, %c0_6], %5 {strides = array<i32>} : memref<8x32xf32, #tpu.memory_space<vmem>>, vector<8x32xf32>,
    return
  }
  func.func @transform_0(%arg0: i32, %arg1: i32) -> (i32, i32) {
    %c0_i32 = arith.constant 0 : i32
    %c0_i32_0 = arith.constant 0 : i32
    return %arg1, %c0_i32 : i32, i32
  }
  func.func @transform_1(%arg0: i32, %arg1: i32) -> (i32, i32) {
    %c0_i32 = arith.constant 0 : i32
    %c0_i32_0 = arith.constant 0 : i32
    return %c0_i32, %arg0 : i32, i32
  }
  func.func @transform_2(%arg0: i32, %arg1: i32) -> (i32, i32) {
    %c0_i32 = arith.constant 0 : i32
    %c0_i32_0 = arith.constant 0 : i32
    return %c0_i32, %arg0 : i32, i32
  }
  func.func @transform_3(%arg0: i32, %arg1: i32) -> (i32, i32) {
    %c0_i32 = arith.constant 0 : i32
    return %arg1, %arg0 : i32, i32
  }
}

</mosaic_0001>

<bundles_post_ra>
// kernel: tpu_custom_call.1
= control target key start
LH: loop header
LB: loop body
LE: loop exit
PB: predicated region body
PF: predicated region fallthrough
CT: control target
= control target key end

     0   :  { %s373_s0 = inlined_call_operand.vmem [shape: f32[8,256], index: 0, kind: input, shape index: {}]   ;;  %s374_s1 = inlined_call_operand.vmem [shape: f32[256,32], index: 1, kind: input, shape index: {}]   ;;  %s375_s2 = inlined_call_operand.vmem [shape: f32[1,32], index: 2, kind: input, shape index: {}]   ;;  %s376_s3 = inlined_call_operand.hbm [shape: f32[8,32], index: 3, kind: output, shape index: {}]  }
   0x1   :  { %v33_v0 = vld [vmem:[%s374_s1 + $0x80] sm:$0xff]  ;;  %v34_v1 = vld [vmem:[%s374_s1 + $0x88] sm:$0xff]  ;;  %v35_v5 = vld [vmem:[%s374_s1 + $0x90] sm:$0xff] }
   0x2   :  { %v17_v2 = vld [vmem:[%s374_s1] sm:$0xff]  ;;  %v178_v3 = vpack.c.bf16 %v34_v1, %v33_v0  ;;  %v18_v4 = vld [vmem:[%s374_s1 + $0x8] sm:$0xff]  ;;  %v36_v6 = vld [vmem:[%s374_s1 + $0x98] sm:$0xff] }
   0x3   :  { %v180_v7 = vpack.c.bf16 %v18_v4, %v17_v2  ;;  %v182_v8 = vpack.c.bf16 %v36_v6, %v35_v5  ;;  %v19_v9 = vld [vmem:[%s374_s1 + $0x10] sm:$0xff]  ;;  %v20_v10 = vld [vmem:[%s374_s1 + $0x18] sm:$0xff]  ;;  %v37_v11 = vld [vmem:[%s374_s1 + $0xa0] sm:$0xff] }
   0x4   :  { %179 = vmatprep.subr.bf16.mxu0 %v178_v3  ;;  %v38_v12 = vld [vmem:[%s374_s1 + $0xa8] sm:$0xff]  ;;  %v184_v13 = vpack.c.bf16 %v20_v10, %v19_v9  ;;  %v21_v15 = vld [vmem:[%s374_s1 + $0x20] sm:$0xff]  ;;  %v39_v17 = vld [vmem:[%s374_s1 + $0xb0] sm:$0xff] }
   0x5   :  { %181 = vmatpush3.bf16.msra.mxu0 %v180_v7  ;;  %v186_v14 = vpack.c.bf16 %v38_v12, %v37_v11  ;;  %v22_v16 = vld [vmem:[%s374_s1 + $0x28] sm:$0xff]  ;;  %v40_v18 = vld [vmem:[%s374_s1 + $0xb8] sm:$0xff]  ;;  %v23_v21 = vld [vmem:[%s374_s1 + $0x30] sm:$0xff] }
   0x6   :  { %183 = vmatprep.subr.bf16.mxu0 %v182_v8  ;;  %v188_v19 = vpack.c.bf16 %v22_v16, %v21_v15  ;;  %v190_v20 = vpack.c.bf16 %v40_v18, %v39_v17  ;;  %v24_v22 = vld [vmem:[%s374_s1 + $0x38] sm:$0xff]  ;;  %v41_v23 = vld [vmem:[%s374_s1 + $0xc0] sm:$0xff]  ;;  %v42_v24 = vld [vmem:[%s374_s1 + $0xc8] sm:$0xff] }
   0x7   :  { %v16_v25 = vld [vmem:[%s373_s0 + $0x8] sm:$0xff] }
   0x8   :  { %120 = vmatprep.mubr.f32.mxu0 %v16_v25 }
   0x9   :  { %185 = vmatpush3.bf16.msra.mxu0 %v184_v13 }
   0xa   :  { %187 = vmatprep.subr.bf16.mxu0 %v186_v14 }
   0xb   :  { %8 = vsyncpa [#allocation3], 0  ;;  %v192_v26 = vpack.c.bf16 %v24_v22, %v23_v21  ;;  %v194_v27 = vpack.c.bf16 %v42_v24, %v41_v23  ;;  %v25_v28 = vld [vmem:[%s374_s1 + $0x40] sm:$0xff]  ;;  %v26_v29 = vld [vmem:[%s374_s1 + $0x48] sm:$0xff]  ;;  %s235_s28 = smov [#allocation2]   ;;  %vm126_vm0 = vcmask 261120  }
   0xc   :  { %v43_v30 = vld [vmem:[%s374_s1 + $0xd0] sm:$0xff]  ;;  %v44_v31 = vld [vmem:[%s374_s1 + $0xd8] sm:$0xff]  ;;  %v196_v32 = vpack.c.bf16 %v26_v29, %v25_v28  ;;  %v45_v36 = vld [vmem:[%s374_s1 + $0xe0] sm:$0xff]  ;;  %s134_s29 = sshll.u32 %s235_s28, 4  ;;  %s135_s29 = int_to_ptr.vmem [resolvable:$true] %s134_s29 }
   0xd   :  { %189 = vmatpush3.bf16.msra.mxu0 %v188_v19  ;;  %v198_v33 = vpack.c.bf16 %v44_v31, %v43_v30  ;;  %v27_v34 = vld [vmem:[%s374_s1 + $0x50] sm:$0xff]  ;;  %v28_v35 = vld [vmem:[%s374_s1 + $0x58] sm:$0xff]  ;;  %v46_v37 = vld [vmem:[%s374_s1 + $0xe8] sm:$0xff]  ;;  %p216_p1 = scmp.lt.s32.totalorder %s135_s29, %s135_s29 }
   0xe   :  { %191 = vmatprep.subr.bf16.mxu0 %v190_v20  ;;  %v200_v38 = vpack.c.bf16 %v28_v35, %v27_v34  ;;  %v202_v39 = vpack.c.bf16 %v46_v37, %v45_v36  ;;  %v29_v40 = vld [vmem:[%s374_s1 + $0x60] sm:$0xff]  ;;  %v30_v41 = vld [vmem:[%s374_s1 + $0x68] sm:$0xff]  ;;  %v47_v42 = vld [vmem:[%s374_s1 + $0xf0] sm:$0xff] }
   0xf   :  { %v48_v43 = vld [vmem:[%s374_s1 + $0xf8] sm:$0xff]  ;;  %v204_v44 = vpack.c.bf16 %v30_v41, %v29_v40  ;;  %v31_v46 = vld [vmem:[%s374_s1 + $0x70] sm:$0xff]  ;;  %v15_v49 = vld [vmem:[%s373_s0] sm:$0xff] }
  0x10   :  { %v206_v45 = vpack.c.bf16 %v48_v43, %v47_v42  ;;  %v32_v47 = vld [vmem:[%s374_s1 + $0x78] sm:$0xff]  ;;  %v142_v51 = vld [vmem:[%s375_s2] ss:$0 sm:$0xff]  ;;  %s211_s1 = scalar_lea.vmem %s135_s29, 128 }
  0x11   :  { %193 = vmatpush3.bf16.msra.mxu0 %v192_v26  ;;  %v208_v48 = vpack.c.bf16 %v32_v47, %v31_v46  ;;  %p212_p0 = scmp.ne.s32.totalorder %s135_s29, %s211_s1  ;;  %p217_p2 = scmp.lt.s32.totalorder %s211_s1, %s211_s1 }
  0x12   :  { %195 = vmatprep.subr.bf16.mxu0 %v194_v27 }
  0x13   :  { %p218_p3 = por %p217_p2, %p216_p1 }
  0x15   :  { %197 = vmatpush3.bf16.msra.mxu0 %v196_v32  ;;  %p219_p4 = pnand %p218_p3, %p212_p0 }
  0x16   :  { %199 = vmatprep.subr.bf16.mxu0 %v198_v33 }
  0x19   :  { %201 = vmatpush3.bf16.msra.mxu0 %v200_v38 }
  0x1a   :  { %203 = vmatprep.subr.bf16.mxu0 %v202_v39 }
  0x1d   :  { %205 = vmatpush3.bf16.msra.mxu0 %v204_v44 }
  0x1e   :  { %207 = vmatprep.subr.bf16.mxu0 %v206_v45 }
  0x21   :  { %209 = vmatpush3.bf16.msra.mxu0 %v208_v48 }
  0x24   :  { %121 = vmatmul.mubr.f32.vlgmr.msra.gmra.mrb[0].mxu0 %v15_v49 }
  0xf7   :  { %v175_v50 = vpop.f32.mrb[0].mxu0 }
  0xf8   :  { %v176_v52 = vpop.f32.mrb[1].mxu0 }
  0xf9   :  { %v177_v53 = vadd.f32 %v176_v52, %v175_v50 }
  0xfb   :  { %v123_v54 = vadd.f32 %v177_v53, %v142_v51 }
  0xfd   :  { %127 = vst.msk [vmem:[#allocation2] sm:$0xff] %vm126_vm0, %v123_v54 }
  0xfe   :  { %222 = shalt.err (!%p219_p4)
}
  0xff   :  { %s223_s4 = scalar_lea.hbm %s376_s3, 128 }
 0x100   :  { %p224_p5 = scmp.ne.s32.totalorder %s376_s3, %s223_s4  ;;  %p227_p6 = scmp.lt.u32.totalorder %s223_s4, %s376_s3 }
 0x102   :  { %p229_p7 = pnand %p227_p6, %p224_p5 }
 0x104   :  { %232 = shalt.err (!%p229_p7)
}
 0x105   :  { %137 = dma.vmem_to_hbm [thread:$0]  %s135_s29, 128, %s376_s3, [#allocation3]  }
 0x106   :  { %233 = dma.done.wait [#allocation3], 128  }
 0x107   :  { %234 = vsyncadd [#allocation3], 4294967168 }
 0x108   :  { %141 = vsyncpa [#allocation3], 1 }

// kernel: tpu_custom_call.1
= control target key start
LH: loop header
LB: loop body
LE: loop exit
PB: predicated region body
PF: predicated region fallthrough
CT: control target
= control target key end

     0   :  { %s373_s0 = inlined_call_operand.vmem [shape: f32[8,256], index: 0, kind: input, shape index: {}]   ;;  %s374_s1 = inlined_call_operand.vmem [shape: f32[256,32], index: 1, kind: input, shape index: {}]   ;;  %s375_s2 = inlined_call_operand.vmem [shape: f32[1,32], index: 2, kind: input, shape index: {}]   ;;  %s376_s3 = inlined_call_operand.hbm [shape: f32[8,32], index: 3, kind: output, shape index: {}]  }
   0x1   :  { %v33_v0 = vld [vmem:[%s374_s1 + $0x80] sm:$0xff]  ;;  %v34_v1 = vld [vmem:[%s374_s1 + $0x88] sm:$0xff]  ;;  %v35_v5 = vld [vmem:[%s374_s1 + $0x90] sm:$0xff] }
   0x2   :  { %v17_v2 = vld [vmem:[%s374_s1] sm:$0xff]  ;;  %v178_v3 = vpack.c.bf16 %v34_v1, %v33_v0  ;;  %v18_v4 = vld [vmem:[%s374_s1 + $0x8] sm:$0xff]  ;;  %v36_v6 = vld [vmem:[%s374_s1 + $0x98] sm:$0xff] }
   0x3   :  { %v180_v7 = vpack.c.bf16 %v18_v4, %v17_v2  ;;  %v182_v8 = vpack.c.bf16 %v36_v6, %v35_v5  ;;  %v19_v9 = vld [vmem:[%s374_s1 + $0x10] sm:$0xff]  ;;  %v20_v10 = vld [vmem:[%s374_s1 + $0x18] sm:$0xff]  ;;  %v37_v11 = vld [vmem:[%s374_s1 + $0xa0] sm:$0xff] }
   0x4   :  { %179 = vmatprep.subr.bf16.mxu0 %v178_v3  ;;  %v38_v12 = vld [vmem:[%s374_s1 + $0xa8] sm:$0xff]  ;;  %v184_v13 = vpack.c.bf16 %v20_v10, %v19_v9  ;;  %v21_v15 = vld [vmem:[%s374_s1 + $0x20] sm:$0xff]  ;;  %v39_v17 = vld [vmem:[%s374_s1 + $0xb0] sm:$0xff] }
   0x5   :  { %181 = vmatpush3.bf16.msra.mxu0 %v180_v7  ;;  %v186_v14 = vpack.c.bf16 %v38_v12, %v37_v11  ;;  %v22_v16 = vld [vmem:[%s374_s1 + $0x28] sm:$0xff]  ;;  %v40_v18 = vld [vmem:[%s374_s1 + $0xb8] sm:$0xff]  ;;  %v23_v21 = vld [vmem:[%s374_s1 + $0x30] sm:$0xff] }
   0x6   :  { %183 = vmatprep.subr.bf16.mxu0 %v182_v8  ;;  %v188_v19 = vpack.c.bf16 %v22_v16, %v21_v15  ;;  %v190_v20 = vpack.c.bf16 %v40_v18, %v39_v17  ;;  %v24_v22 = vld [vmem:[%s374_s1 + $0x38] sm:$0xff]  ;;  %v41_v23 = vld [vmem:[%s374_s1 + $0xc0] sm:$0xff]  ;;  %v42_v24 = vld [vmem:[%s374_s1 + $0xc8] sm:$0xff] }
   0x7   :  { %v16_v25 = vld [vmem:[%s373_s0 + $0x8] sm:$0xff] }
   0x8   :  { %120 = vmatprep.mubr.f32.mxu0 %v16_v25 }
   0x9   :  { %185 = vmatpush3.bf16.msra.mxu0 %v184_v13 }
   0xa   :  { %187 = vmatprep.subr.bf16.mxu0 %v186_v14 }
   0xb   :  { %8 = vsyncpa [#allocation3], 0  ;;  %v192_v26 = vpack.c.bf16 %v24_v22, %v23_v21  ;;  %v194_v27 = vpack.c.bf16 %v42_v24, %v41_v23  ;;  %v25_v28 = vld [vmem:[%s374_s1 + $0x40] sm:$0xff]  ;;  %v26_v29 = vld [vmem:[%s374_s1 + $0x48] sm:$0xff]  ;;  %s235_s28 = smov [#allocation2]   ;;  %vm126_vm0 = vcmask 261120  }
   0xc   :  { %v43_v30 = vld [vmem:[%s374_s1 + $0xd0] sm:$0xff]  ;;  %v44_v31 = vld [vmem:[%s374_s1 + $0xd8] sm:$0xff]  ;;  %v196_v32 = vpack.c.bf16 %v26_v29, %v25_v28  ;;  %v45_v36 = vld [vmem:[%s374_s1 + $0xe0] sm:$0xff]  ;;  %s134_s29 = sshll.u32 %s235_s28, 4  ;;  %s135_s29 = int_to_ptr.vmem [resolvable:$true] %s134_s29 }
   0xd   :  { %189 = vmatpush3.bf16.msra.mxu0 %v188_v19  ;;  %v198_v33 = vpack.c.bf16 %v44_v31, %v43_v30  ;;  %v27_v34 = vld [vmem:[%s374_s1 + $0x50] sm:$0xff]  ;;  %v28_v35 = vld [vmem:[%s374_s1 + $0x58] sm:$0xff]  ;;  %v46_v37 = vld [vmem:[%s374_s1 + $0xe8] sm:$0xff]  ;;  %p216_p1 = scmp.lt.s32.totalorder %s135_s29, %s135_s29 }
   0xe   :  { %191 = vmatprep.subr.bf16.mxu0 %v190_v20  ;;  %v200_v38 = vpack.c.bf16 %v28_v35, %v27_v34  ;;  %v202_v39 = vpack.c.bf16 %v46_v37, %v45_v36  ;;  %v29_v40 = vld [vmem:[%s374_s1 + $0x60] sm:$0xff]  ;;  %v30_v41 = vld [vmem:[%s374_s1 + $0x68] sm:$0xff]  ;;  %v47_v42 = vld [vmem:[%s374_s1 + $0xf0] sm:$0xff] }
   0xf   :  { %v48_v43 = vld [vmem:[%s374_s1 + $0xf8] sm:$0xff]  ;;  %v204_v44 = vpack.c.bf16 %v30_v41, %v29_v40  ;;  %v31_v46 = vld [vmem:[%s374_s1 + $0x70] sm:$0xff]  ;;  %v15_v49 = vld [vmem:[%s373_s0] sm:$0xff] }
  0x10   :  { %v206_v45 = vpack.c.bf16 %v48_v43, %v47_v42  ;;  %v32_v47 = vld [vmem:[%s374_s1 + $0x78] sm:$0xff]  ;;  %v142_v51 = vld [vmem:[%s375_s2] ss:$0 sm:$0xff]  ;;  %s211_s1 = scalar_lea.vmem %s135_s29, 128 }
  0x11   :  { %193 = vmatpush3.bf16.msra.mxu0 %v192_v26  ;;  %v208_v48 = vpack.c.bf16 %v32_v47, %v31_v46  ;;  %p212_p0 = scmp.ne.s32.totalorder %s135_s29, %s211_s1  ;;  %p217_p2 = scmp.lt.s32.totalorder %s211_s1, %s211_s1 }
  0x12   :  { %195 = vmatprep.subr.bf16.mxu0 %v194_v27 }
  0x13   :  { %p218_p3 = por %p217_p2, %p216_p1 }
  0x15   :  { %197 = vmatpush3.bf16.msra.mxu0 %v196_v32  ;;  %p219_p4 = pnand %p218_p3, %p212_p0 }
  0x16   :  { %199 = vmatprep.subr.bf16.mxu0 %v198_v33 }
  0x19   :  { %201 = vmatpush3.bf16.msra.mxu0 %v200_v38 }
  0x1a   :  { %203 = vmatprep.subr.bf16.mxu0 %v202_v39 }
  0x1d   :  { %205 = vmatpush3.bf16.msra.mxu0 %v204_v44 }
  0x1e   :  { %207 = vmatprep.subr.bf16.mxu0 %v206_v45 }
  0x21   :  { %209 = vmatpush3.bf16.msra.mxu0 %v208_v48 }
  0x24   :  { %121 = vmatmul.mubr.f32.vlgmr.msra.gmra.mrb[0].mxu0 %v15_v49 }
  0xf7   :  { %v175_v50 = vpop.f32.mrb[0].mxu0 }
  0xf8   :  { %v176_v52 = vpop.f32.mrb[1].mxu0 }
  0xf9   :  { %v177_v53 = vadd.f32 %v176_v52, %v175_v50 }
  0xfb   :  { %v123_v54 = vadd.f32 %v177_v53, %v142_v51 }
  0xfd   :  { %127 = vst.msk [vmem:[#allocation2] sm:$0xff] %vm126_vm0, %v123_v54 }
  0xfe   :  { %222 = shalt.err (!%p219_p4)
}
  0xff   :  { %s223_s4 = scalar_lea.hbm %s376_s3, 128 }
 0x100   :  { %p224_p5 = scmp.ne.s32.totalorder %s376_s3, %s223_s4  ;;  %p227_p6 = scmp.lt.u32.totalorder %s223_s4, %s376_s3 }
 0x102   :  { %p229_p7 = pnand %p227_p6, %p224_p5 }
 0x104   :  { %232 = shalt.err (!%p229_p7)
}
 0x105   :  { %137 = dma.vmem_to_hbm [thread:$0]  %s135_s29, 128, %s376_s3, [#allocation3]  }
 0x106   :  { %233 = dma.done.wait [#allocation3], 128  }
 0x107   :  { %234 = vsyncadd [#allocation3], 4294967168 }
 0x108   :  { %141 = vsyncpa [#allocation3], 1 }

</bundles_post_ra>
